<compile_context>
chip_gen: v7x
topology: tpu7x:2x2x1
jax: 0.10.0
libtpu: 0.0.40
codegen_flags: <defaults>
</compile_context>

<pallas_src>
import math
from functools import partial

import jax
import jax.numpy as jnp
from jax.experimental import pallas as pl
from jax.experimental.pallas import tpu as pltpu


# ----------------------------------------------------------------------------
# Pallas kernel: synthetic UNet block (proj-in + temb add + cross-attn + proj-out)
# All activations kept transposed: [DH, T] with tokens on the lane axis.
# ----------------------------------------------------------------------------
def _unet_block_kernel(
    x_ref,       # (1, C_PAD, T)   bf16  latent tokens, channel-major
    temb_ref,    # (1, DH, 1)      f32   timestep embedding column
    k_ref,       # (1, S_PAD, DH)  bf16  pre-projected keys (hoisted, per-batch)
    vt_ref,      # (1, DH, S_PAD)  bf16  pre-projected values, transposed
    win_t_ref,   # (DH, C_PAD)     bf16
    wq_t_ref,    # (DH, DH)        bf16
    wo_t_ref,    # (DH, DH)        bf16
    wout_t_ref,  # (C, DH)         bf16
    noise_ref,   # (1, C, T)       f32   output: noise prediction (lane-dense)
    feat_ref,    # (1, DH, T)      bf16  output: feature map (lane-dense)
    *,
    s_valid: int,
):
    f32 = jnp.float32
    bf16 = jnp.bfloat16

    x = x_ref[0]       # [C_PAD, T]  bf16
    temb = temb_ref[0]  # [DH, 1]     f32 (broadcasts over T lanes)
    k = k_ref[0]       # [S_PAD, DH] bf16
    vt = vt_ref[0]     # [DH, S_PAD] bf16

    # proj-in + timestep conditioning (bf16 MXU, f32 accumulation)
    h = jnp.dot(win_t_ref[...], x, preferred_element_type=f32) + temb        # [DH, T]

    # single-head cross attention; k/v come pre-projected from the wrapper.
    q = jnp.dot(wq_t_ref[...], h.astype(bf16), preferred_element_type=f32)   # [DH, T]

    scale = 1.0 / math.sqrt(q.shape[0])
    s = jnp.dot(k, q.astype(bf16), preferred_element_type=f32) * scale       # [S_PAD, T]

    # mask zero-padded key rows (sublane axis); softmax stays in f32.
    if s_valid < s.shape[0]:  # static Python check - no-op when S == S_PAD
        row = jax.lax.broadcasted_iota(jnp.int32, s.shape, 0)
        s = jnp.where(row < s_valid, s, jnp.float32(-1e30))
    s = s - jnp.max(s, axis=0, keepdims=True)
    p = jnp.exp(s)
    p = p * pl.reciprocal(jnp.sum(p, axis=0, keepdims=True), approx=True)

    attn = jnp.dot(vt, p.astype(bf16), preferred_element_type=f32)           # [DH, T]

    # residual + inner projection; no transposes needed anywhere.
    h2 = h + jnp.dot(wo_t_ref[...], attn.astype(bf16),
                     preferred_element_type=f32)                             # [DH, T]

    feat_ref[0] = h2.astype(feat_ref.dtype)
    noise_ref[0] = jnp.dot(wout_t_ref[...], h2.astype(bf16),
                           preferred_element_type=f32).astype(noise_ref.dtype)  # [C, T]


def _vmem_capacity_bytes():
    try:
        return int(pltpu.get_tpu_info().vmem_capacity_bytes)
    except Exception:
        return 64 << 20  # conservative (v7x per-core figure)


def _unet_pallas(x_t, temb, k, vt, weights, *, s_valid, latent_channels, tile_hw,
                 vmem_limit_bytes):
    """x_t: [B, C_PAD, HW] bf16, temb: [B, DH, 1] f32,
       k: [B, S_PAD, DH] bf16, vt: [B, DH, S_PAD] bf16."""
    B, C_PAD, HW = x_t.shape
    _, S_PAD, DH = k.shape
    C = latent_channels
    n_hw = HW // tile_hw

    win_t, wq_t, wo_t, wout_t = weights

    # Weights are grid-invariant -> single-buffer them (saves VMEM, no re-fetch).
    wspec = lambda shape: pl.BlockSpec(shape, lambda b, t: (0, 0),
                                       pipeline_mode=pl.Buffered(1))

    flops = 2 * B * HW * (
        C_PAD * DH            # proj-in
        + DH * DH             # q
        + 2 * S_PAD * DH      # scores, attn @ v
        + DH * DH             # wo
        + DH * C              # output projection
    )
    transcendentals = B * HW * S_PAD
    bytes_accessed = (
        x_t.size * x_t.dtype.itemsize
        + temb.size * temb.dtype.itemsize
        + k.size * k.dtype.itemsize
        + vt.size * vt.dtype.itemsize
        + sum(w.size * w.dtype.itemsize for w in weights)
        + B * C * HW * 4          # noise (f32)
        + B * DH * HW * 2         # feat (bf16)
    )

    noise_t, feat_t = pl.pallas_call(
        partial(_unet_block_kernel, s_valid=s_valid),
        out_shape=(
            jax.ShapeDtypeStruct((B, C, HW), jnp.float32),
            jax.ShapeDtypeStruct((B, DH, HW), jnp.bfloat16),
        ),
        grid_spec=pl.GridSpec(
            grid=(B, n_hw),
            in_specs=[
                pl.BlockSpec((1, C_PAD, tile_hw), lambda b, t: (b, 0, t)),  # latents
                pl.BlockSpec((1, DH, 1), lambda b, t: (b, 0, 0)),           # temb
                pl.BlockSpec((1, S_PAD, DH), lambda b, t: (b, 0, 0)),       # k
                pl.BlockSpec((1, DH, S_PAD), lambda b, t: (b, 0, 0)),       # v^T
                wspec((DH, C_PAD)),   # win^T
                wspec((DH, DH)),      # wq^T
                wspec((DH, DH)),      # wo^T
                wspec((C, DH)),       # wout^T
            ],
            out_specs=[
                pl.BlockSpec((1, C, tile_hw), lambda b, t: (b, 0, t)),
                pl.BlockSpec((1, DH, tile_hw), lambda b, t: (b, 0, t)),
            ],
        ),
        compiler_params=pltpu.CompilerParams(
            dimension_semantics=("parallel", "parallel"),
            vmem_limit_bytes=vmem_limit_bytes,
        ),
        cost_estimate=pl.CostEstimate(
            flops=flops,
            transcendentals=transcendentals,
            bytes_accessed=bytes_accessed,
        ),
    )(x_t, temb, k, vt, win_t, wq_t, wo_t, wout_t)
    return noise_t, feat_t


# ----------------------------------------------------------------------------
# Glue: timestep embedding, padding / layout, parameter init
# ----------------------------------------------------------------------------
def _sinusoidal_timestep_embedding(timesteps, dim):
    """Sinusoidal embedding, float32, shape [B, dim].
    Note: [cos, sin] half ordering (diffusers flip_sin_to_cos=True path); the
    UNet here is synthetic so exact half ordering is not load-bearing."""
    half = dim // 2
    freqs = jnp.exp(
        -math.log(10000.0) * jnp.arange(half, dtype=jnp.float32) / half
    )
    args = timesteps.astype(jnp.float32)[:, None] * freqs[None, :]
    return jnp.concatenate([jnp.cos(args), jnp.sin(args)], axis=-1)


def init_ip_adapter_params(key, latent_channels, hidden_dim, cross_dim):
    ks = jax.random.split(key, 6)
    s = lambda fan_in: 1.0 / math.sqrt(fan_in)
    return {
        "win":  jax.random.normal(ks[0], (latent_channels, hidden_dim), jnp.float32) * s(latent_channels),
        "wq":   jax.random.normal(ks[1], (hidden_dim, hidden_dim), jnp.float32) * s(hidden_dim),
        "wk":   jax.random.normal(ks[2], (cross_dim, hidden_dim), jnp.float32) * s(cross_dim),
        "wv":   jax.random.normal(ks[3], (cross_dim, hidden_dim), jnp.float32) * s(cross_dim),
        "wo":   jax.random.normal(ks[4], (hidden_dim, hidden_dim), jnp.float32) * s(hidden_dim),
        "wout": jax.random.normal(ks[5], (hidden_dim, latent_channels), jnp.float32) * s(hidden_dim),
    }


def _pick_tile_hw(hw, vmem_cap):
    # v5e/v6e (128 MiB VMEM, single serial TC grid) benefit from a 512 tile;
    # v7x (64 MiB VMEM, 2 TCs splitting the grid) stays at 256.
    max_tile = 512 if vmem_cap >= (100 << 20) else 256
    for t in (max_tile, 256, 128):
        if t <= hw and hw % t == 0:
            return t
    return hw


@partial(jax.jit, static_argnames=("hidden_dim",))
def ip_adapter_forward(params, noisy_latents, timesteps, encoder_hidden_states,
                       global_tokens, hidden_dim):
    """Mirrors IPAdapter.forward:
       cat along seq dim -> unet(noisy_latents, timesteps, ehs) -> (noise_pred, feat)."""
    # 1. encoder_hidden_states = torch.cat([encoder_hidden_states, global_tokens], dim=1)
    ehs = jnp.concatenate([encoder_hidden_states, global_tokens], axis=1)

    # 2. unet forward (synthetic block), hot path in Pallas.
    B, C, H, W = noisy_latents.shape
    HW = H * W
    S = ehs.shape[1]
    DH = hidden_dim

    # padding for MXU-friendly contractions (zero pad -> numerics unchanged).
    # S lives on the sublane axis in the transposed layout, so a multiple of 8
    # is sufficient (no need to pad to 128).
    c_pad = -(-C // 8) * 8          # 4 -> 8
    s_pad = -(-S // 8) * 8          # 12 -> 16

    # latents: straight NCHW reshape -> [B, C, HW] (tokens on the lane axis);
    # no wrapper-side transpose needed.
    x_t = noisy_latents.reshape(B, C, HW)
    x_t = jnp.pad(x_t, ((0, 0), (0, c_pad - C), (0, 0))).astype(jnp.bfloat16)

    temb = _sinusoidal_timestep_embedding(timesteps, DH).reshape(B, DH, 1)

    # k/v projections hoisted out of the HW grid: they depend only on the batch
    # index, so compute them once per batch here (tiny S x DC x DH matmuls).
    k = jnp.einsum("bsd,dh->bsh", ehs, params["wk"])                 # [B, S, DH]
    v = jnp.einsum("bsd,dh->bsh", ehs, params["wv"])                 # [B, S, DH]
    k = jnp.pad(k, ((0, 0), (0, s_pad - S), (0, 0))).astype(jnp.bfloat16)
    vt = jnp.pad(jnp.transpose(v, (0, 2, 1)),
                 ((0, 0), (0, 0), (0, s_pad - S))).astype(jnp.bfloat16)  # [B, DH, S_PAD]

    # pre-transposed weights for the [DH, T] activation layout.
    win_t = jnp.pad(params["win"].T, ((0, 0), (0, c_pad - C))).astype(jnp.bfloat16)  # [DH, C_PAD]
    wq_t = params["wq"].T.astype(jnp.bfloat16)
    wo_t = params["wo"].T.astype(jnp.bfloat16)
    wout_t = params["wout"].T.astype(jnp.bfloat16)                   # [C, DH]

    vmem_cap = _vmem_capacity_bytes()
    tile_hw = _pick_tile_hw(HW, vmem_cap)
    vmem_limit = min(int(vmem_cap * 3 // 4), 96 << 20)

    noise_t, feat_t = _unet_pallas(
        x_t, temb, k, vt, (win_t, wq_t, wo_t, wout_t),
        s_valid=S, latent_channels=C, tile_hw=tile_hw,
        vmem_limit_bytes=vmem_limit)

    # lane-dense kernel outputs reshape straight back to NCHW (no transposes).
    noise_pred = noise_t.reshape(B, C, H, W)
    feat_map = feat_t.reshape(B, DH, H, W)

    # feat = out_list[-1:][::-1] -> a (reversed) list holding the last output.
    feat = (feat_map,)
    return noise_pred, feat
    # TODO(synk): the full diffusers UNet2DConditionModel (down/mid/up blocks,
    # GroupNorm, many attn layers) is an injected submodule with no definition
    # in this file; only this representative cross-attention block is kernelized.


# ----------------------------------------------------------------------------
# Demo
# ----------------------------------------------------------------------------
if __name__ == "__main__":
    B, C, H, W = 2, 4, 16, 16      # noisy latents
    S_TEXT, S_GLOBAL = 8, 4        # text tokens, global (IP) tokens
    D_CROSS = 128                  # encoder hidden size (768 in the real model)
    D_HIDDEN = 128                 # UNet inner dim (MXU-aligned)

    key = jax.random.PRNGKey(0)
    k_p, k_x, k_e, k_g, k_t = jax.random.split(key, 5)

    params = init_ip_adapter_params(k_p, C, D_HIDDEN, D_CROSS)

    noisy_latents = jax.random.normal(k_x, (B, C, H, W), jnp.float32)
    encoder_hidden_states = jax.random.normal(k_e, (B, S_TEXT, D_CROSS), jnp.float32)
    global_tokens = jax.random.normal(k_g, (B, S_GLOBAL, D_CROSS), jnp.float32)
    timesteps = jax.random.randint(k_t, (B,), 0, 1000).astype(jnp.int32)

    noise_pred, feat = ip_adapter_forward(
        params, noisy_latents, timesteps, encoder_hidden_states, global_tokens,
        hidden_dim=D_HIDDEN,
    )
    noise_pred = jax.block_until_ready(noise_pred)
    feat0 = jax.block_until_ready(feat[0])

    assert noise_pred.shape == (B, C, H, W)
    assert feat0.shape == (B, D_HIDDEN, H, W)
    assert jnp.all(jnp.isfinite(noise_pred)) and jnp.all(jnp.isfinite(feat0.astype(jnp.float32)))
    print("KERNEL_OK")
</pallas_src>

<mosaic_0001>
module attributes {stable_mosaic.version = 11 : i64} {
  func.func @_unet_block_kernel(%arg0: i32, %arg1: i32, %arg2: memref<1x8x256xbf16, #tpu.memory_space<vmem>>, %arg3: memref<1x128x1xf32, #tpu.memory_space<vmem>>, %arg4: memref<1x16x128xbf16, #tpu.memory_space<vmem>>, %arg5: memref<1x128x16xbf16, #tpu.memory_space<vmem>>, %arg6: memref<128x8xbf16, #tpu.memory_space<vmem>>, %arg7: memref<128x128xbf16, #tpu.memory_space<vmem>>, %arg8: memref<128x128xbf16, #tpu.memory_space<vmem>>, %arg9: memref<4x128xbf16, #tpu.memory_space<vmem>>, %arg10: memref<1x4x256xf32, #tpu.memory_space<vmem>>, %arg11: memref<1x128x256xbf16, #tpu.memory_space<vmem>>) attributes {dimension_semantics = [#tpu.dimension_semantics<parallel>, #tpu.dimension_semantics<parallel>], iteration_bounds = array<i64: 2, 1>, scalar_prefetch = 0 : i64, scratch_operands = 0 : i64, tpu.core_type = #tpu.core_type<tc>, window_params = [{transform_indices = @transform_0, window_bounds = array<i64: 1, 8, 256>}, {transform_indices = @transform_1, window_bounds = array<i64: 1, 128, 1>}, {transform_indices = @transform_2, window_bounds = array<i64: 1, 16, 128>}, {transform_indices = @transform_3, window_bounds = array<i64: 1, 128, 16>}, {pipeline_mode = #tpu.pipeline_mode<synchronous>, transform_indices = @transform_4, window_bounds = array<i64: 128, 8>}, {pipeline_mode = #tpu.pipeline_mode<synchronous>, transform_indices = @transform_5, window_bounds = array<i64: 128, 128>}, {pipeline_mode = #tpu.pipeline_mode<synchronous>, transform_indices = @transform_6, window_bounds = array<i64: 128, 128>}, {pipeline_mode = #tpu.pipeline_mode<synchronous>, transform_indices = @transform_7, window_bounds = array<i64: 4, 128>}, {transform_indices = @transform_8, window_bounds = array<i64: 1, 4, 256>}, {transform_indices = @transform_9, window_bounds = array<i64: 1, 128, 256>}]} {
    %c0 = arith.constant 0 : index
    %c0_0 = arith.constant 0 : index
    %c0_1 = arith.constant 0 : index
    %0 = vector.load %arg2[%c0, %c0_0, %c0_1] : memref<1x8x256xbf16, #tpu.memory_space<vmem>>, vector<1x8x256xbf16>
    %1 = vector.shape_cast %0 : vector<1x8x256xbf16> to vector<8x256xbf16>
    %c0_2 = arith.constant 0 : index
    %c0_3 = arith.constant 0 : index
    %c0_4 = arith.constant 0 : index
    %2 = vector.load %arg3[%c0_2, %c0_3, %c0_4] : memref<1x128x1xf32, #tpu.memory_space<vmem>>, vector<1x128x1xf32>
    %3 = vector.shape_cast %2 : vector<1x128x1xf32> to vector<128x1xf32>
    %c0_5 = arith.constant 0 : index
    %c0_6 = arith.constant 0 : index
    %c0_7 = arith.constant 0 : index
    %4 = vector.load %arg4[%c0_5, %c0_6, %c0_7] : memref<1x16x128xbf16, #tpu.memory_space<vmem>>, vector<1x16x128xbf16>
    %5 = vector.shape_cast %4 : vector<1x16x128xbf16> to vector<16x128xbf16>
    %c0_8 = arith.constant 0 : index
    %c0_9 = arith.constant 0 : index
    %c0_10 = arith.constant 0 : index
    %6 = vector.load %arg5[%c0_8, %c0_9, %c0_10] : memref<1x128x16xbf16, #tpu.memory_space<vmem>>, vector<1x128x16xbf16>
    %7 = vector.shape_cast %6 : vector<1x128x16xbf16> to vector<128x16xbf16>
    %c0_11 = arith.constant 0 : index
    %c0_12 = arith.constant 0 : index
    %8 = vector.load %arg6[%c0_11, %c0_12] : memref<128x8xbf16, #tpu.memory_space<vmem>>, vector<128x8xbf16>
    %cst = arith.constant dense<0.000000e+00> : vector<128x256xf32>
    %9 = tpu.matmul %8, %1, %cst {dimension_numbers = #tpu.dot_dimension_numbers<[1], [0], [0], [1], [0, 0, 1, 1], [], []>} : vector<128x8xbf16>, vector<8x256xbf16>, vector<128x256xf32> -> vector<128x256xf32>
    %10 = vector.broadcast %3 : vector<128x1xf32> to vector<128x256xf32>
    %11 = arith.addf %9, %10 : vector<128x256xf32>
    %c0_13 = arith.constant 0 : index
    %c0_14 = arith.constant 0 : index
    %12 = vector.load %arg7[%c0_13, %c0_14] : memref<128x128xbf16, #tpu.memory_space<vmem>>, vector<128x128xbf16>
    %13 = arith.truncf %11 : vector<128x256xf32> to vector<128x256xbf16>
    %cst_15 = arith.constant dense<0.000000e+00> : vector<128x256xf32>
    %14 = tpu.matmul %12, %13, %cst_15 {dimension_numbers = #tpu.dot_dimension_numbers<[1], [0], [0], [1], [0, 0, 1, 1], [], []>} : vector<128x128xbf16>, vector<128x256xbf16>, vector<128x256xf32> -> vector<128x256xf32>
    %15 = arith.truncf %14 : vector<128x256xf32> to vector<128x256xbf16>
    %cst_16 = arith.constant dense<0.000000e+00> : vector<16x256xf32>
    %16 = tpu.matmul %5, %15, %cst_16 {dimension_numbers = #tpu.dot_dimension_numbers<[1], [0], [0], [1], [0, 0, 1, 1], [], []>} : vector<16x128xbf16>, vector<128x256xbf16>, vector<16x256xf32> -> vector<16x256xf32>
    %cst_17 = arith.constant 0.0883883461 : f32
    %17 = vector.broadcast %cst_17 : f32 to vector<16x256xf32>
    %18 = arith.mulf %16, %17 : vector<16x256xf32>
    %19 = tpu.iota {dimensions = array<i32: 0>} : vector<16x256xi32>
    %c12_i32 = arith.constant 12 : i32
    %20 = vector.broadcast %c12_i32 : i32 to vector<16x256xi32>
    %21 = arith.cmpi slt, %19, %20 : vector<16x256xi32>
    %cst_18 = arith.constant -1.000000e+30 : f32
    %22 = vector.broadcast %cst_18 : f32 to vector<16x256xf32>
    %23 = arith.select %21, %18, %22 : vector<16x256xi1>, vector<16x256xf32>
    %cst_19 = arith.constant dense<0xFF800000> : vector<256xf32>
    %24 = vector.multi_reduction <maximumf>, %23, %cst_19 [0] : vector<16x256xf32> to vector<256xf32>
    %25 = vector.shape_cast %24 : vector<256xf32> to vector<1x256xf32>
    %26 = vector.broadcast %25 : vector<1x256xf32> to vector<16x256xf32>
    %27 = arith.subf %23, %26 : vector<16x256xf32>
    %28 = math.exp %27 : vector<16x256xf32>
    %cst_20 = arith.constant dense<0.000000e+00> : vector<256xf32>
    %29 = vector.multi_reduction <add>, %28, %cst_20 [0] : vector<16x256xf32> to vector<256xf32>
    %30 = vector.shape_cast %29 : vector<256xf32> to vector<1x256xf32>
    %31 = tpu.reciprocal %30 {approx = true} : vector<1x256xf32> -> vector<1x256xf32>
    %32 = vector.broadcast %31 : vector<1x256xf32> to vector<16x256xf32>
    %33 = arith.mulf %28, %32 : vector<16x256xf32>
    %34 = arith.truncf %33 : vector<16x256xf32> to vector<16x256xbf16>
    %cst_21 = arith.constant dense<0.000000e+00> : vector<128x256xf32>
    %35 = tpu.matmul %7, %34, %cst_21 {dimension_numbers = #tpu.dot_dimension_numbers<[1], [0], [0], [1], [0, 0, 1, 1], [], []>} : vector<128x16xbf16>, vector<16x256xbf16>, vector<128x256xf32> -> vector<128x256xf32>
    %c0_22 = arith.constant 0 : index
    %c0_23 = arith.constant 0 : index
    %36 = vector.load %arg8[%c0_22, %c0_23] : memref<128x128xbf16, #tpu.memory_space<vmem>>, vector<128x128xbf16>
    %37 = arith.truncf %35 : vector<128x256xf32> to vector<128x256xbf16>
    %cst_24 = arith.constant dense<0.000000e+00> : vector<128x256xf32>
    %38 = tpu.matmul %36, %37, %cst_24 {dimension_numbers = #tpu.dot_dimension_numbers<[1], [0], [0], [1], [0, 0, 1, 1], [], []>} : vector<128x128xbf16>, vector<128x256xbf16>, vector<128x256xf32> -> vector<128x256xf32>
    %39 = arith.addf %11, %38 : vector<128x256xf32>
    %40 = arith.truncf %39 : vector<128x256xf32> to vector<128x256xbf16>
    %c0_25 = arith.constant 0 : index
    %c0_26 = arith.constant 0 : index
    %c0_27 = arith.constant 0 : index
    %41 = vector.load %arg11[%c0_25, %c0_26, %c0_27] : memref<1x128x256xbf16, #tpu.memory_space<vmem>>, vector<1x128x256xbf16>
    %42 = vector.shape_cast %41 : vector<1x128x256xbf16> to vector<128x256xbf16>
    %43 = vector.shape_cast %40 : vector<128x256xbf16> to vector<1x128x256xbf16>
    tpu.vector_store %arg11[%c0_25, %c0_26, %c0_27], %43 {strides = array<i32>} : memref<1x128x256xbf16, #tpu.memory_space<vmem>>, vector<1x128x256xbf16>,
    %c0_28 = arith.constant 0 : index
    %c0_29 = arith.constant 0 : index
    %44 = vector.load %arg9[%c0_28, %c0_29] : memref<4x128xbf16, #tpu.memory_space<vmem>>, vector<4x128xbf16>
    %45 = arith.truncf %39 : vector<128x256xf32> to vector<128x256xbf16>
    %cst_30 = arith.constant dense<0.000000e+00> : vector<4x256xf32>
    %46 = tpu.matmul %44, %45, %cst_30 {dimension_numbers = #tpu.dot_dimension_numbers<[1], [0], [0], [1], [0, 0, 1, 1], [], []>} : vector<4x128xbf16>, vector<128x256xbf16>, vector<4x256xf32> -> vector<4x256xf32>
    %c0_31 = arith.constant 0 : index
    %c0_32 = arith.constant 0 : index
    %c0_33 = arith.constant 0 : index
    %47 = vector.load %arg10[%c0_31, %c0_32, %c0_33] : memref<1x4x256xf32, #tpu.memory_space<vmem>>, vector<1x4x256xf32>
    %48 = vector.shape_cast %47 : vector<1x4x256xf32> to vector<4x256xf32>
    %49 = vector.shape_cast %46 : vector<4x256xf32> to vector<1x4x256xf32>
    tpu.vector_store %arg10[%c0_31, %c0_32, %c0_33], %49 {strides = array<i32>} : memref<1x4x256xf32, #tpu.memory_space<vmem>>, vector<1x4x256xf32>,
    return
  }
  func.func @transform_0(%arg0: i32, %arg1: i32) -> (i32, i32, i32) {
    %c0_i32 = arith.constant 0 : i32
    %c0_i32_0 = arith.constant 0 : i32
    return %arg0, %c0_i32, %arg1 : i32, i32, i32
  }
  func.func @transform_1(%arg0: i32, %arg1: i32) -> (i32, i32, i32) {
    %c0_i32 = arith.constant 0 : i32
    %c0_i32_0 = arith.constant 0 : i32
    %c0_i32_1 = arith.constant 0 : i32
    return %arg0, %c0_i32, %c0_i32_0 : i32, i32, i32
  }
  func.func @transform_2(%arg0: i32, %arg1: i32) -> (i32, i32, i32) {
    %c0_i32 = arith.constant 0 : i32
    %c0_i32_0 = arith.constant 0 : i32
    %c0_i32_1 = arith.constant 0 : i32
    return %arg0, %c0_i32, %c0_i32_0 : i32, i32, i32
  }
  func.func @transform_3(%arg0: i32, %arg1: i32) -> (i32, i32, i32) {
    %c0_i32 = arith.constant 0 : i32
    %c0_i32_0 = arith.constant 0 : i32
    %c0_i32_1 = arith.constant 0 : i32
    return %arg0, %c0_i32, %c0_i32_0 : i32, i32, i32
  }
  func.func @transform_4(%arg0: i32, %arg1: i32) -> (i32, i32) {
    %c0_i32 = arith.constant 0 : i32
    %c0_i32_0 = arith.constant 0 : i32
    %c0_i32_1 = arith.constant 0 : i32
    return %c0_i32, %c0_i32_0 : i32, i32
  }
  func.func @transform_5(%arg0: i32, %arg1: i32) -> (i32, i32) {
    %c0_i32 = arith.constant 0 : i32
    %c0_i32_0 = arith.constant 0 : i32
    %c0_i32_1 = arith.constant 0 : i32
    return %c0_i32, %c0_i32_0 : i32, i32
  }
  func.func @transform_6(%arg0: i32, %arg1: i32) -> (i32, i32) {
    %c0_i32 = arith.constant 0 : i32
    %c0_i32_0 = arith.constant 0 : i32
    %c0_i32_1 = arith.constant 0 : i32
    return %c0_i32, %c0_i32_0 : i32, i32
  }
  func.func @transform_7(%arg0: i32, %arg1: i32) -> (i32, i32) {
    %c0_i32 = arith.constant 0 : i32
    %c0_i32_0 = arith.constant 0 : i32
    %c0_i32_1 = arith.constant 0 : i32
    return %c0_i32, %c0_i32_0 : i32, i32
  }
  func.func @transform_8(%arg0: i32, %arg1: i32) -> (i32, i32, i32) {
    %c0_i32 = arith.constant 0 : i32
    %c0_i32_0 = arith.constant 0 : i32
    return %arg0, %c0_i32, %arg1 : i32, i32, i32
  }
  func.func @transform_9(%arg0: i32, %arg1: i32) -> (i32, i32, i32) {
    %c0_i32 = arith.constant 0 : i32
    %c0_i32_0 = arith.constant 0 : i32
    return %arg0, %c0_i32, %arg1 : i32, i32, i32
  }
}

</mosaic_0001>

<bundles_post_ra>
// kernel: ip_adapter_forward.1
= control target key start
LH: loop header
LB: loop body
LE: loop exit
PB: predicated region body
PF: predicated region fallthrough
CT: control target
= control target key end

     0   :  { %s2090_s30 = smov 0   ;;  %s2092_s10 = smov 0   ;;  %s2455_s0 = inlined_call_operand.vmem [shape: bf16[2,8,256], index: 0, kind: input, shape index: {}]   ;;  %s2456_s1 = inlined_call_operand.vmem [shape: f32[2,128,1], index: 1, kind: input, shape index: {}]   ;;  %s2457_s2 = inlined_call_operand.vmem [shape: bf16[2,16,128], index: 2, kind: input, shape index: {}]   ;;  %s2458_s3 = inlined_call_operand.vmem [shape: bf16[2,128,16], index: 3, kind: input, shape index: {}]   ;;  %s2459_s4 = inlined_call_operand.vmem [shape: bf16[128,8], index: 4, kind: input, shape index: {}]   ;;  %s2460_s5 = inlined_call_operand.vmem [shape: bf16[128,128], index: 5, kind: input, shape index: {}]   ;;  %s2461_s6 = inlined_call_operand.vmem [shape: bf16[128,128], index: 6, kind: input, shape index: {}]   ;;  %s2462_s7 = inlined_call_operand.vmem [shape: bf16[4,128], index: 7, kind: input, shape index: {}]   ;;  %s2463_s8 = inlined_call_operand.vmem [shape: f32[2,4,256], index: 8, kind: output, shape index: {0}]   ;;  %s2464_s9 = inlined_call_operand.vmem [shape: bf16[2,128,256], index: 9, kind: output, shape index: {1}]  }
   0x1   :  { %s2094_s11 = smov 0  }
   0x2 LB: > { %s32_s12 = sadd.s32 1, %s2033_s10  ;;  %p1836_p0 = scmp.ge.s32.totalorder %s2037_s11, 1  ;;  %s2037_s11 = sphi %s2094_s11, %s20_s11   ;;  %s2033_s10 = sphi %s2092_s10, %s2466_s10   ;;  %s2029_s30 = sphi %s2090_s30, %s2465_s30  }
   0x3   : > { %p34_p1 = scmp.ge.s32.totalorder %s32_s12, 2  ;;  %p343_p2 = scmp.lt.s32.totalorder %s2037_s11, 3 }
   0x5   : > { %s2468_s12 = smov (%p34_p1, %s32_s12), 0  ;;  %p344_p3 = pnand %p1836_p0, %p343_p2 }
   0x6   : > { %p412_p4 = scmp.lt.s32.totalorder (!%p344_p3), %s2029_s30, 1  ;;  %v2039_v0 = vmov (!%p344_p3), 0   ;;  %vm658_vm0 = vcmask (!%p344_p3), 1043456   ;;  %v1971_v5 = vld [vmem:[%s2459_s4] sm:$0xff] (!%p344_p3)   ;;  %vm633_vm1 = vcmask (!%p344_p3), 64512   ;;  %v1972_v12 = vld [vmem:[%s2459_s4 + $0x8] sm:$0xff] (!%p344_p3)  }
   0x7   : > { %347 = sbr.rel (%p344_p3) target bundleno = 1634 (0x662), region = 52  ;;  %697 = vmatprep.mubr.bf16.mxu0 (!%p344_p3), %v2039_v0  ;;  %1966 = vset.pattern.permute.xlu0 (!%p344_p3), %v2039_v0  ;;  %v1973_v17 = vld [vmem:[%s2459_s4 + $0x10] sm:$0xff] (!%p344_p3)   ;;  %v1974_v22 = vld [vmem:[%s2459_s4 + $0x18] sm:$0xff] (!%p344_p3)   ;;  %v1975_v25 = vld [vmem:[%s2459_s4 + $0x20] sm:$0xff] (!%p344_p3)   ;;  %vm1137_vm3 = vcmask (!%p344_p3), 130048  }
   0x8   : > { %1967 = vset.pattern.permute.xlu1 (!%p344_p3), %v2039_v0  ;;  %890 = vmatprep.mubr.bf16.mxu1 (!%p344_p3), %v2039_v0  ;;  %v1976_v26 = vld [vmem:[%s2459_s4 + $0x28] sm:$0xff] (!%p344_p3)   ;;  %v1977_v27 = vld [vmem:[%s2459_s4 + $0x30] sm:$0xff] (!%p344_p3)   ;;  %v1978_v28 = vld [vmem:[%s2459_s4 + $0x38] sm:$0xff] (!%p344_p3)  }
   0xe   : > { %s2470_s30 = smov (!%p412_p4, %s2029_s30), 1 }
   0xf   : > { %s2115_s13 = sshll.u32 %s2470_s30, 3  ;;  %s1920_s14 = sshll.u32 %s2470_s30, 7 }
  0x10   : > { %s419_s17 = scalar_lea.vmem %s2455_s0, %s2115_s13  ;;  %s2127_s20 = scalar_lea.vmem %s2456_s1, %s1920_s14 }
  0x11   : > { %s430_s23 = scalar_lea.vmem %s2457_s2, %s2115_s13  ;;  %v457_v1 = vld [vmem:[%s419_s17] sm:$0xff]  ;;  %v460_v7 = vld [vmem:[%s2127_s20 + $0x10] sm:$0xff]  ;;  %v459_v8 = vld [vmem:[%s2127_s20 + $0x8] sm:$0xff]  ;;  %s1922_s26 = sshll.u32 %s2470_s30, 6 }
  0x12   : > { %v1858_v2 = vcombine.high %v457_v1, %v457_v1  ;;  %v1857_v3 = vcombine.low %v457_v1, %v457_v1  ;;  %v458_v6 = vld [vmem:[%s2127_s20] sm:$0xff]  ;;  %520 = vperm.xlu1 %1967, %v460_v7   ;;  %v461_v9 = vld [vmem:[%s2127_s20 + $0x18] sm:$0xff]  ;;  %v463_v11 = vld [vmem:[%s2127_s20 + $0x28] sm:$0xff]  ;;  %s2153_s16 = scalar_lea.vmem %s2458_s3, %s1922_s26  ;;  %s2391_s24 = scalar_lea.vmem %s2464_s9, %s1920_s14 }
  0x13   : > { %510 = vperm.xlu0 %1966, %v458_v6   ;;  %v462_v10 = vld [vmem:[%s2127_s20 + $0x20] sm:$0xff]  ;;  %v464_v13 = vld [vmem:[%s2127_s20 + $0x30] sm:$0xff]  ;;  %v465_v14 = vld [vmem:[%s2127_s20 + $0x38] sm:$0xff] }
  0x14   : > { %1859 = vmatprep.subr.msk.bf16.mxu0 %vm658_vm0, %v1858_v2  ;;  %v660_v4 = vsel %vm658_vm0, %v1857_v3, 0  ;;  %v466_v15 = vld [vmem:[%s2127_s20 + $0x40] sm:$0xff]  ;;  %v467_v16 = vld [vmem:[%s2127_s20 + $0x48] sm:$0xff]  ;;  %v468_v18 = vld [vmem:[%s2127_s20 + $0x50] sm:$0xff] }
  0x15   : > { %666 = vmatpush1.bf16.msra.mxu0 %v660_v4  ;;  %v469_v19 = vld [vmem:[%s2127_s20 + $0x58] sm:$0xff]  ;;  %v470_v20 = vld [vmem:[%s2127_s20 + $0x60] sm:$0xff]  ;;  %v471_v21 = vld [vmem:[%s2127_s20 + $0x68] sm:$0xff] }
  0x16   : > { %525 = vperm.xlu1 %1967, %v461_v9   ;;  %v472_v23 = vld [vmem:[%s2127_s20 + $0x70] sm:$0xff]  ;;  %v473_v24 = vld [vmem:[%s2127_s20 + $0x78] sm:$0xff]  ;;  %s444_s20 = scalar_lea.vmem %s2463_s8, %s2115_s13 }
  0x17   : > { %515 = vperm.xlu0 %1966, %v459_v8  }
  0x18   : > { %1860 = vmatmul.mubr.msk.bf16.vlgmr.msra.gmra.mrb[0].mxu0 %vm633_vm1, %v1971_v5 }
  0x19   : > { %707 = vmatprep.mubr.bf16.mxu0 %v2039_v0 }
  0x1a   : > { %535 = vperm.xlu1 %1967, %v463_v11  }
  0x1b   : > { %530 = vperm.xlu0 %1966, %v462_v10  }
  0x1e   : > { %545 = vperm.xlu1 %1967, %v465_v14  }
  0x1f   : > { %540 = vperm.xlu0 %1966, %v464_v13  }
  0x20   : > { %1861 = vmatmul.mubr.msk.bf16.gmra.mrb[4].mxu0 %vm633_vm1, %v1972_v12 }
  0x21   : > { %717 = vmatprep.mubr.bf16.mxu0 %v2039_v0 }
  0x22   : > { %555 = vperm.xlu1 %1967, %v467_v16  }
  0x23   : > { %550 = vperm.xlu0 %1966, %v466_v15  }
  0x26   : > { %565 = vperm.xlu1 %1967, %v469_v19  }
  0x27   : > { %560 = vperm.xlu0 %1966, %v468_v18  }
  0x28   : > { %1862 = vmatmul.mubr.msk.bf16.gmra.mrb[8].mxu0 %vm633_vm1, %v1973_v17 }
  0x29   : > { %727 = vmatprep.mubr.bf16.mxu0 %v2039_v0 }
  0x2a   : > { %575 = vperm.xlu1 %1967, %v471_v21  }
  0x2b   : > { %570 = vperm.xlu0 %1966, %v470_v20  }
  0x2e   : > { %585 = vperm.xlu1 %1967, %v473_v24  }
  0x2f   : > { %580 = vperm.xlu0 %1966, %v472_v23  }
  0x30   : > { %1863 = vmatmul.mubr.msk.bf16.gmra.mrb[12].mxu0 %vm633_vm1, %v1974_v22 }
  0x31   : > { %737 = vmatprep.mubr.bf16.mxu0 %v2039_v0 }
  0x38   : > { %1864 = vmatmul.mubr.msk.bf16.gmra.mrb[16].mxu0 %vm633_vm1, %v1975_v25 }
  0x39   : > { %747 = vmatprep.mubr.bf16.mxu0 %v2039_v0 }
  0x40   : > { %1865 = vmatmul.mubr.msk.bf16.gmra.mrb[20].mxu0 %vm633_vm1, %v1976_v26 }
  0x41   : > { %757 = vmatprep.mubr.bf16.mxu0 %v2039_v0 }
  0x48   : > { %1866 = vmatmul.mubr.msk.bf16.gmra.mrb[24].mxu0 %vm633_vm1, %v1977_v27 }
  0x49   : > { %767 = vmatprep.mubr.bf16.mxu0 %v2039_v0 }
  0x50   : > { %1867 = vmatmul.mubr.msk.bf16.gmra.mrb[28].mxu0 %vm633_vm1, %v1978_v28 }
  0x51   : > { %1025 = vmatprep.mubr.bf16.mxu0 %v2039_v0 }
  0x91   : > { %v521_v37 = vpop.permute.xlu1 %520 }
  0x92   : > { %v511_v29 = vpop.permute.xlu0 %510 }
  0x95   : > { %v526_v44 = vpop.permute.xlu1 %525 }
  0x96   : > { %v516_v31 = vpop.permute.xlu0 %515 }
  0x99   : > { %v536_v55 = vpop.permute.xlu1 %535 }
  0x9a   : > { %v531_v57 = vpop.permute.xlu0 %530 }
  0x9d   : > { %v546_v4 = vpop.permute.xlu1 %545 }
  0x9e   : > { %v541_v6 = vpop.permute.xlu0 %540 }
  0xa1   : > { %v556_v16 = vpop.permute.xlu1 %555 }
  0xa2   : > { %v551_v18 = vpop.permute.xlu0 %550 }
  0xa5   : > { %v566_v28 = vpop.permute.xlu1 %565 }
  0xeb   : > { %v699_v30 = vpop.f32.mrb[0].mxu0 }
  0xec   : > { %v701_v32 = vpop.f32.mrb[1].mxu0  ;;  %v2201_v39 = vadd.f32 %v699_v30, %v511_v29  ;;  %v561_v30 = vpop.permute.xlu0 %560 }
  0xed   : > { %v703_v33 = vpop.f32.mrb[2].mxu0  ;;  %v2197_v36 = vadd.f32 %v701_v32, %v511_v29 }
  0xee   : > { %v2195_v34 = vadd.f32 %v703_v33, %v516_v31  ;;  %v705_v35 = vpop.f32.mrb[3].mxu0 }
  0xef   : > { %v2199_v38 = vadd.f32 %v705_v35, %v516_v31 }
  0xf0   : > { %v794_v41 = vpack.c.bf16 %v2195_v34, %v2201_v39 }
  0xf1   : > { %v795_v40 = vpack.c.bf16 %v2199_v38, %v2197_v36 }
  0xf3   : > { %v709_v42 = vpop.f32.mrb[4].mxu0  ;;  %858 = vmatprep.subr.bf16.mxu1 %v795_v40 }
  0xf4   : > { %v711_v43 = vpop.f32.mrb[5].mxu0  ;;  %859 = vmatpush1.bf16.msra.mxu1 %v794_v41  ;;  %v2213_v50 = vadd.f32 %v709_v42, %v521_v37 }
  0xf5   : > { %v713_v45 = vpop.f32.mrb[6].mxu0  ;;  %v2209_v48 = vadd.f32 %v711_v43, %v521_v37 }
  0xf6   : > { %v2207_v46 = vadd.f32 %v713_v45, %v526_v44  ;;  %v715_v47 = vpop.f32.mrb[7].mxu0 }
  0xf7   : > { %v2211_v49 = vadd.f32 %v715_v47, %v526_v44  ;;  %v576_v44 = vpop.permute.xlu1 %575  ;;  %v571_v47 = vpop.permute.xlu0 %570 }
  0xf8   : > { %v796_v52 = vpack.c.bf16 %v2207_v46, %v2213_v50 }
  0xf9   : > { %v797_v51 = vpack.c.bf16 %v2211_v49, %v2209_v48 }
  0xfb   : > { %v719_v53 = vpop.f32.mrb[8].mxu0  ;;  %860 = vmatprep.subr.bf16.mxu1 %v797_v51 }
  0xfc   : > { %v721_v54 = vpop.f32.mrb[9].mxu0  ;;  %861 = vmatpush1.bf16.msra.mxu1 %v796_v52  ;;  %v2225_v62 = vadd.f32 %v719_v53, %v531_v57 }
  0xfd   : > { %v723_v56 = vpop.f32.mrb[10].mxu0  ;;  %v2221_v60 = vadd.f32 %v721_v54, %v531_v57 }
  0xfe   : > { %v2219_v58 = vadd.f32 %v723_v56, %v536_v55  ;;  %v725_v59 = vpop.f32.mrb[11].mxu0 }
  0xff   : > { %v2223_v61 = vadd.f32 %v725_v59, %v536_v55 }
 0x100   : > { %v798_v1 = vpack.c.bf16 %v2219_v58, %v2225_v62 }
 0x101   : > { %v799_v63 = vpack.c.bf16 %v2223_v61, %v2221_v60 }
 0x103   : > { %v729_v2 = vpop.f32.mrb[12].mxu0  ;;  %862 = vmatprep.subr.bf16.mxu1 %v799_v63 }
 0x104   : > { %v731_v3 = vpop.f32.mrb[13].mxu0  ;;  %863 = vmatpush1.bf16.msra.mxu1 %v798_v1  ;;  %v2237_v11 = vadd.f32 %v729_v2, %v541_v6  ;;  %v586_v1 = vpop.permute.xlu1 %585 }
 0x105   : > { %v733_v5 = vpop.f32.mrb[14].mxu0  ;;  %v2233_v9 = vadd.f32 %v731_v3, %v541_v6  ;;  %v581_v3 = vpop.permute.xlu0 %580 }
 0x106   : > { %v2231_v7 = vadd.f32 %v733_v5, %v546_v4  ;;  %v735_v8 = vpop.f32.mrb[15].mxu0 }
 0x107   : > { %v2235_v10 = vadd.f32 %v735_v8, %v546_v4 }
 0x108   : > { %v800_v13 = vpack.c.bf16 %v2231_v7, %v2237_v11 }
 0x109   : > { %v801_v12 = vpack.c.bf16 %v2235_v10, %v2233_v9 }
 0x10b   : > { %v739_v14 = vpop.f32.mrb[16].mxu0  ;;  %864 = vmatprep.subr.bf16.mxu1 %v801_v12 }
 0x10c   : > { %v741_v15 = vpop.f32.mrb[17].mxu0  ;;  %865 = vmatpush1.bf16.msra.mxu1 %v800_v13  ;;  %v2249_v23 = vadd.f32 %v739_v14, %v551_v18 }
 0x10d   : > { %v743_v17 = vpop.f32.mrb[18].mxu0  ;;  %v2245_v21 = vadd.f32 %v741_v15, %v551_v18  ;;  %v1979_v15 = vld [vmem:[%s2460_s5] sm:$0xff]   ;;  %v1982_v18 = vld [vmem:[%s2460_s5 + $0x18] sm:$0xff]  }
 0x10e   : > { %v2243_v19 = vadd.f32 %v743_v17, %v556_v16  ;;  %v745_v20 = vpop.f32.mrb[19].mxu0  ;;  %v1981_v17 = vld [vmem:[%s2460_s5 + $0x10] sm:$0xff]  }
 0x10f   : > { %v2247_v22 = vadd.f32 %v745_v20, %v556_v16  ;;  %v1980_v16 = vld [vmem:[%s2460_s5 + $0x8] sm:$0xff]   ;;  %v1983_v20 = vld [vmem:[%s2460_s5 + $0x20] sm:$0xff]  }
 0x110   : > { %v802_v25 = vpack.c.bf16 %v2243_v19, %v2249_v23 }
 0x111   : > { %v803_v24 = vpack.c.bf16 %v2247_v22, %v2245_v21 }
 0x113   : > { %v749_v26 = vpop.f32.mrb[20].mxu0  ;;  %866 = vmatprep.subr.bf16.mxu1 %v803_v24  ;;  %v1984_v24 = vld [vmem:[%s2460_s5 + $0x28] sm:$0xff]  }
 0x114   : > { %v751_v27 = vpop.f32.mrb[21].mxu0  ;;  %867 = vmatpush1.bf16.msra.mxu1 %v802_v25  ;;  %v2261_v37 = vadd.f32 %v749_v26, %v561_v30  ;;  %v1985_v25 = vld [vmem:[%s2460_s5 + $0x30] sm:$0xff]   ;;  %v1986_v26 = vld [vmem:[%s2460_s5 + $0x38] sm:$0xff]  }
 0x115   : > { %v753_v29 = vpop.f32.mrb[22].mxu0  ;;  %v2257_v33 = vadd.f32 %v751_v27, %v561_v30 }
 0x116   : > { %v2255_v31 = vadd.f32 %v753_v29, %v566_v28  ;;  %v755_v32 = vpop.f32.mrb[23].mxu0 }
 0x117   : > { %v2259_v35 = vadd.f32 %v755_v32, %v566_v28 }
 0x118   : > { %v804_v41 = vpack.c.bf16 %v2255_v31, %v2261_v37 }
 0x119   : > { %v805_v40 = vpack.c.bf16 %v2259_v35, %v2257_v33 }
 0x11b   : > { %v759_v42 = vpop.f32.mrb[24].mxu0  ;;  %868 = vmatprep.subr.bf16.mxu1 %v805_v40 }
 0x11c   : > { %v761_v43 = vpop.f32.mrb[25].mxu0  ;;  %869 = vmatpush1.bf16.msra.mxu1 %v804_v41  ;;  %v2273_v55 = vadd.f32 %v759_v42, %v571_v47 }
 0x11d   : > { %v763_v45 = vpop.f32.mrb[26].mxu0  ;;  %v2269_v53 = vadd.f32 %v761_v43, %v571_v47 }
 0x11e   : > { %v2267_v51 = vadd.f32 %v763_v45, %v576_v44  ;;  %v765_v52 = vpop.f32.mrb[27].mxu0 }
 0x11f   : > { %v2271_v54 = vadd.f32 %v765_v52, %v576_v44 }
 0x120   : > { %v806_v57 = vpack.c.bf16 %v2267_v51, %v2273_v55 }
 0x121   : > { %v807_v56 = vpack.c.bf16 %v2271_v54, %v2269_v53 }
 0x123   : > { %v769_v59 = vpop.f32.mrb[28].mxu0  ;;  %870 = vmatprep.subr.bf16.mxu1 %v807_v56 }
 0x124   : > { %v771_v63 = vpop.f32.mrb[29].mxu0  ;;  %871 = vmatpush1.bf16.msra.mxu1 %v806_v57  ;;  %v2285_v12 = vadd.f32 %v769_v59, %v581_v3 }
 0x125   : > { %v773_v2 = vpop.f32.mrb[30].mxu0  ;;  %v2281_v6 = vadd.f32 %v771_v63, %v581_v3 }
 0x126   : > { %v2279_v4 = vadd.f32 %v773_v2, %v586_v1  ;;  %v775_v5 = vpop.f32.mrb[31].mxu0 }
 0x127   : > { %v2283_v8 = vadd.f32 %v775_v5, %v586_v1 }
 0x128   : > { %v808_v14 = vpack.c.bf16 %v2279_v4, %v2285_v12 }
 0x129   : > { %v809_v13 = vpack.c.bf16 %v2283_v8, %v2281_v6 }
 0x12b   : > { %872 = vmatprep.subr.bf16.mxu1 %v809_v13 }
 0x12c   : > { %873 = vmatpush1.bf16.msra.mxu1 %v808_v14 }
 0x12f   : > { %891 = vmatmul.mubr.bf16.vlgmr.msra.gmra.mrb[0].mxu1 %v1979_v15 }
 0x130   : > { %900 = vmatprep.mubr.bf16.mxu1 %v2039_v0 }
 0x137   : > { %901 = vmatmul.mubr.bf16.gmra.mrb[4].mxu1 %v1980_v16 }
 0x138   : > { %910 = vmatprep.mubr.bf16.mxu1 %v2039_v0 }
 0x13f   : > { %911 = vmatmul.mubr.bf16.gmra.mrb[8].mxu1 %v1981_v17 }
 0x140   : > { %920 = vmatprep.mubr.bf16.mxu1 %v2039_v0 }
 0x147   : > { %921 = vmatmul.mubr.bf16.gmra.mrb[12].mxu1 %v1982_v18 }
 0x148   : > { %930 = vmatprep.mubr.bf16.mxu1 %v2039_v0 }
 0x14f   : > { %931 = vmatmul.mubr.bf16.gmra.mrb[16].mxu1 %v1983_v20 }
 0x150   : > { %940 = vmatprep.mubr.bf16.mxu1 %v2039_v0 }
 0x157   : > { %941 = vmatmul.mubr.bf16.gmra.mrb[20].mxu1 %v1984_v24 }
 0x158   : > { %950 = vmatprep.mubr.bf16.mxu1 %v2039_v0 }
 0x15f   : > { %951 = vmatmul.mubr.bf16.gmra.mrb[24].mxu1 %v1985_v25 }
 0x160   : > { %960 = vmatprep.mubr.bf16.mxu1 %v2039_v0 }
 0x167   : > { %961 = vmatmul.mubr.bf16.gmra.mrb[28].mxu1 %v1986_v26 }
 0x168   : > { %1387 = vmatprep.mubr.bf16.mxu1 %v2039_v0 }
 0x202   : > { %v892_v27 = vpop.f32.mrb[0].mxu1 }
 0x203   : > { %v894_v28 = vpop.f32.mrb[1].mxu1 }
 0x204   : > { %v896_v29 = vpop.f32.mrb[2].mxu1 }
 0x205   : > { %v971_v30 = vpack.c.bf16 %v896_v29, %v892_v27  ;;  %v898_v32 = vpop.f32.mrb[3].mxu1 }
 0x206   : > { %v972_v40 = vpack.c.bf16 %v898_v32, %v894_v28 }
 0x208   : > { %993 = vmatprep.subr.bf16.mxu0 %v972_v40 }
 0x209   : > { %994 = vmatpush1.bf16.msra.mxu0 %v971_v30 }
 0x20a   : > { %v902_v41 = vpop.f32.mrb[4].mxu1 }
 0x20b   : > { %v904_v42 = vpop.f32.mrb[5].mxu1 }
 0x20c   : > { %v906_v43 = vpop.f32.mrb[6].mxu1 }
 0x20d   : > { %v973_v44 = vpack.c.bf16 %v906_v43, %v902_v41  ;;  %v908_v45 = vpop.f32.mrb[7].mxu1 }
 0x20e   : > { %v974_v47 = vpack.c.bf16 %v908_v45, %v904_v42 }
 0x210   : > { %995 = vmatprep.subr.bf16.mxu0 %v974_v47 }
 0x211   : > { %996 = vmatpush1.bf16.msra.mxu0 %v973_v44 }
 0x212   : > { %v912_v52 = vpop.f32.mrb[8].mxu1 }
 0x213   : > { %v914_v56 = vpop.f32.mrb[9].mxu1 }
 0x214   : > { %v916_v57 = vpop.f32.mrb[10].mxu1 }
 0x215   : > { %v975_v59 = vpack.c.bf16 %v916_v57, %v912_v52  ;;  %v918_v63 = vpop.f32.mrb[11].mxu1 }
 0x216   : > { %v976_v1 = vpack.c.bf16 %v918_v63, %v914_v56 }
 0x218   : > { %997 = vmatprep.subr.bf16.mxu0 %v976_v1  ;;  %v1969_v1 = vld [vmem:[%s430_s23] sm:$0xff]  }
 0x219   : > { %998 = vmatpush1.bf16.msra.mxu0 %v975_v59 }
 0x21a   : > { %v922_v2 = vpop.f32.mrb[12].mxu1 }
 0x21b   : > { %v924_v3 = vpop.f32.mrb[13].mxu1 }
 0x21c   : > { %v926_v5 = vpop.f32.mrb[14].mxu1 }
 0x21d   : > { %v977_v13 = vpack.c.bf16 %v926_v5, %v922_v2  ;;  %v928_v14 = vpop.f32.mrb[15].mxu1  ;;  %v1040_v2 = vlaneseq }
 0x21e   : > { %v978_v15 = vpack.c.bf16 %v928_v14, %v924_v3 }
 0x21f   : > { %v1041_v3 = vshrl.u32 %v1040_v2, 7 }
 0x220   : > { %999 = vmatprep.subr.bf16.mxu0 %v978_v15 }
 0x221   : > { %1000 = vmatpush1.bf16.msra.mxu0 %v977_v13  ;;  %v1042_v5 = vadd.s32 8, %v1041_v3 }
 0x222   : > { %v932_v16 = vpop.f32.mrb[16].mxu1 }
 0x223   : > { %v934_v17 = vpop.f32.mrb[17].mxu1  ;;  %vm1044_vm2 = vcmp.lt.s32.totalorder %v1042_v5, 12 }
 0x224   : > { %v936_v18 = vpop.f32.mrb[18].mxu1 }
 0x225   : > { %v979_v20 = vpack.c.bf16 %v936_v18, %v932_v16  ;;  %v938_v24 = vpop.f32.mrb[19].mxu1 }
 0x226   : > { %v980_v25 = vpack.c.bf16 %v938_v24, %v934_v17 }
 0x228   : > { %1001 = vmatprep.subr.bf16.mxu0 %v980_v25 }
 0x229   : > { %1002 = vmatpush1.bf16.msra.mxu0 %v979_v20 }
 0x22a   : > { %v942_v26 = vpop.f32.mrb[20].mxu1 }
 0x22b   : > { %v944_v27 = vpop.f32.mrb[21].mxu1 }
 0x22c   : > { %v946_v28 = vpop.f32.mrb[22].mxu1 }
 0x22d   : > { %v981_v29 = vpack.c.bf16 %v946_v28, %v942_v26  ;;  %v948_v30 = vpop.f32.mrb[23].mxu1 }
 0x22e   : > { %v982_v32 = vpack.c.bf16 %v948_v30, %v944_v27 }
 0x230   : > { %1003 = vmatprep.subr.bf16.mxu0 %v982_v32 }
 0x231   : > { %1004 = vmatpush1.bf16.msra.mxu0 %v981_v29 }
 0x232   : > { %v952_v40 = vpop.f32.mrb[24].mxu1 }
 0x233   : > { %v954_v41 = vpop.f32.mrb[25].mxu1 }
 0x234   : > { %v956_v42 = vpop.f32.mrb[26].mxu1 }
 0x235   : > { %v983_v43 = vpack.c.bf16 %v956_v42, %v952_v40  ;;  %v958_v44 = vpop.f32.mrb[27].mxu1 }
 0x236   : > { %v984_v45 = vpack.c.bf16 %v958_v44, %v954_v41 }
 0x238   : > { %1005 = vmatprep.subr.bf16.mxu0 %v984_v45 }
 0x239   : > { %1006 = vmatpush1.bf16.msra.mxu0 %v983_v43 }
 0x23a   : > { %v962_v47 = vpop.f32.mrb[28].mxu1 }
 0x23b   : > { %v964_v52 = vpop.f32.mrb[29].mxu1 }
 0x23c   : > { %v966_v56 = vpop.f32.mrb[30].mxu1 }
 0x23d   : > { %v985_v57 = vpack.c.bf16 %v966_v56, %v962_v47  ;;  %v968_v59 = vpop.f32.mrb[31].mxu1 }
 0x23e   : > { %v986_v63 = vpack.c.bf16 %v968_v59, %v964_v52 }
 0x240   : > { %1007 = vmatprep.subr.bf16.mxu0 %v986_v63 }
 0x241   : > { %1008 = vmatpush1.bf16.msra.mxu0 %v985_v57 }
 0x244   : > { %1026 = vmatmul.mubr.bf16.vlgmr.msra.gmra.mrb[32].mxu0 %v1969_v1 }
 0x245   : > { %1194 = vmatprep.mubr.bf16.mxu0 %v2039_v0 }
 0x317   : > { %v1027_v13 = vpop.f32.mrb[32].mxu0 }
 0x318   : > { %v1029_v14 = vpop.f32.mrb[33].mxu0  ;;  %v1036_v18 = vmul.f32 0.088388346, %v1027_v13 }
 0x319   : > { %v1031_v15 = vpop.f32.mrb[34].mxu0  ;;  %v1037_v24 = vmul.f32 0.088388346, %v1029_v14 }
 0x31a   : > { %v1038_v16 = vmul.f32 0.088388346, %v1031_v15  ;;  %v1033_v17 = vpop.f32.mrb[35].mxu0 }
 0x31b   : > { %v1039_v20 = vmul.f32 0.088388346, %v1033_v17 }
 0x31c   : > { %v1047_v25 = vsel %vm1044_vm2, %v1038_v16, -1e+30 }
 0x31d   : > { %v1049_v26 = vmax.f32 %v1036_v18, %v1047_v25  ;;  %v1048_v27 = vsel %vm1044_vm2, %v1039_v20, -1e+30 }
 0x31e   : > { %v1056_v28 = vmax.f32 %v1037_v24, %v1048_v27 }
 0x31f   : > { %v1050_v29 = vrot.slane %v1049_v26, 4 }
 0x320   : > { %v1057_v30 = vrot.slane %v1056_v28, 4 }
 0x321   : > { %v1051_v32 = vmax.f32 %v1049_v26, %v1050_v29 }
 0x322   : > { %v1058_v40 = vmax.f32 %v1056_v28, %v1057_v30 }
 0x323   : > { %v1052_v41 = vrot.slane %v1051_v32, 2 }
 0x324   : > { %v1059_v42 = vrot.slane %v1058_v40, 2 }
 0x325   : > { %v1053_v43 = vmax.f32 %v1051_v32, %v1052_v41 }
 0x326   : > { %v1060_v44 = vmax.f32 %v1058_v40, %v1059_v42 }
 0x327   : > { %v1054_v45 = vrot.slane %v1053_v43, 1 }
 0x328   : > { %v1061_v47 = vrot.slane %v1060_v44, 1 }
 0x329   : > { %v1055_v52 = vmax.f32 %v1053_v43, %v1054_v45 }
 0x32a   : > { %v1062_v56 = vmax.f32 %v1060_v44, %v1061_v47 }
 0x32b   : > { %v1063_v57 = vsub.f32 %v1036_v18, %v1055_v52  ;;  %v1065_v59 = vsub.f32 %v1047_v25, %v1055_v52 }
 0x32c   : > { %v1064_v63 = vsub.f32 %v1037_v24, %v1062_v56  ;;  %v1066_v1 = vsub.f32 %v1048_v27, %v1062_v56 }
 0x32d   : > { %v1067_v2 = vmul.f32 1.442695, %v1063_v57  ;;  %v1071_v3 = vmul.f32 1.442695, %v1065_v59 }
 0x32e   : > { %v1069_v5 = vmul.f32 1.442695, %v1064_v63  ;;  %v1073_v13 = vmul.f32 1.442695, %v1066_v1  ;;  %v1987_v1 = vld [vmem:[%s2153_s16] sm:$0xff]  }
 0x32f   : > { %2003 = vpow2.f32 %v1067_v2  ;;  %v1988_v2 = vld [vmem:[%s2153_s16 + $0x8] sm:$0xff]  }
 0x330   : > { %2005 = vpow2.f32 %v1071_v3  ;;  %v1989_v3 = vld [vmem:[%s2153_s16 + $0x10] sm:$0xff]  }
 0x331   : > { %2007 = vpow2.f32 %v1069_v5  ;;  %v1990_v5 = vld [vmem:[%s2153_s16 + $0x18] sm:$0xff]  }
 0x332   : > { %2009 = vpow2.f32 %v1073_v13  ;;  %v1991_v13 = vld [vmem:[%s2153_s16 + $0x20] sm:$0xff]  }
 0x339   : > { %v2004_v14 = vpop.eup %2003 }
 0x33a   : > { %v2006_v15 = vpop.eup %2005 }
 0x33b   : > { %v2008_v16 = vpop.eup %2007  ;;  %v1075_v17 = vadd.f32 %v2006_v15, %v2004_v14 }
 0x33c   : > { %v2010_v20 = vpop.eup %2009 }
 0x33d   : > { %v1076_v26 = vrot.slane %v1075_v17, 4  ;;  %v1082_v28 = vadd.f32 %v2010_v20, %v2008_v16 }
 0x33f   : > { %v1077_v29 = vadd.f32 %v1076_v26, %v1075_v17  ;;  %v1083_v18 = vrot.slane %v1082_v28, 4 }
 0x341   : > { %v1078_v25 = vrot.slane %v1077_v29, 2  ;;  %v1084_v24 = vadd.f32 %v1083_v18, %v1082_v28 }
 0x343   : > { %v1079_v27 = vadd.f32 %v1078_v25, %v1077_v29  ;;  %v1085_v30 = vrot.slane %v1084_v24, 2 }
 0x345   : > { %v1080_v32 = vrot.slane %v1079_v27, 1  ;;  %v1086_v40 = vadd.f32 %v1085_v30, %v1084_v24 }
 0x347   : > { %v1087_v41 = vrot.slane %v1086_v40, 1  ;;  %v1081_v42 = vadd.f32 %v1080_v32, %v1079_v27 }
 0x349   : > { %v1088_v43 = vadd.f32 %v1087_v41, %v1086_v40  ;;  %2011 = vrcp.f32 %v1081_v42 }
 0x34b   : > { %2013 = vrcp.f32 %v1088_v43 }
 0x353   : > { %v2012_v44 = vpop.eup %2011 }
 0x354   : > { %v1091_v45 = vmul.f32 %v2012_v44, %v2004_v14  ;;  %v1093_v47 = vmul.f32 %v2012_v44, %v2006_v15  ;;  %v1992_v14 = vld [vmem:[%s2153_s16 + $0x28] sm:$0xff]   ;;  %v1993_v15 = vld [vmem:[%s2153_s16 + $0x30] sm:$0xff]  }
 0x355   : > { %v2014_v52 = vpop.eup %2013 }
 0x356   : > { %v1092_v56 = vmul.f32 %v2014_v52, %v2008_v16  ;;  %v1094_v57 = vmul.f32 %v2014_v52, %v2010_v20  ;;  %v1095_v59 = vpack.c.bf16 %v1093_v47, %v1091_v45  ;;  %v1994_v16 = vld [vmem:[%s2153_s16 + $0x38] sm:$0xff]  }
 0x358   : > { %v1096_v63 = vpack.c.bf16 %v1094_v57, %v1092_v56 }
 0x35a   : > { %1162 = vmatprep.subr.bf16.mxu0 %v1096_v63 }
 0x35b   : > { %1163 = vmatpush1.bf16.msra.mxu0 %v1095_v59 }
 0x35e   : > { %1885 = vmatmul.mubr.msk.bf16.vlgmr.msra.gmra.mrb[36].mxu0 %vm1137_vm3, %v1987_v1 }
 0x35f   : > { %1204 = vmatprep.mubr.bf16.mxu0 %v2039_v0 }
 0x366   : > { %1886 = vmatmul.mubr.msk.bf16.gmra.mrb[40].mxu0 %vm1137_vm3, %v1988_v2 }
 0x367   : > { %1214 = vmatprep.mubr.bf16.mxu0 %v2039_v0 }
 0x36e   : > { %1887 = vmatmul.mubr.msk.bf16.gmra.mrb[44].mxu0 %vm1137_vm3, %v1989_v3 }
 0x36f   : > { %1224 = vmatprep.mubr.bf16.mxu0 %v2039_v0 }
 0x376   : > { %1888 = vmatmul.mubr.msk.bf16.gmra.mrb[48].mxu0 %vm1137_vm3, %v1990_v5 }
 0x377   : > { %1234 = vmatprep.mubr.bf16.mxu0 %v2039_v0 }
 0x37e   : > { %1889 = vmatmul.mubr.msk.bf16.gmra.mrb[52].mxu0 %vm1137_vm3, %v1991_v13 }
 0x37f   : > { %1244 = vmatprep.mubr.bf16.mxu0 %v2039_v0 }
 0x386   : > { %1890 = vmatmul.mubr.msk.bf16.gmra.mrb[56].mxu0 %vm1137_vm3, %v1992_v14 }
 0x387   : > { %1254 = vmatprep.mubr.bf16.mxu0 %v2039_v0 }
 0x38e   : > { %1891 = vmatmul.mubr.msk.bf16.gmra.mrb[60].mxu0 %vm1137_vm3, %v1993_v15 }
 0x38f   : > { %1264 = vmatprep.mubr.bf16.mxu0 %v2039_v0 }
 0x396   : > { %1892 = vmatmul.mubr.msk.bf16.gmra.mrb[64].mxu0 %vm1137_vm3, %v1994_v16 }
 0x397   : > { %1645 = vmatprep.mubr.bf16.mxu0 %v2039_v0 }
 0x431   : > { %v1196_v17 = vpop.f32.mrb[36].mxu0 }
 0x432   : > { %v1198_v20 = vpop.f32.mrb[37].mxu0 }
 0x433   : > { %v1200_v26 = vpop.f32.mrb[38].mxu0 }
 0x434   : > { %v1291_v28 = vpack.c.bf16 %v1200_v26, %v1196_v17  ;;  %v1202_v29 = vpop.f32.mrb[39].mxu0 }
 0x435   : > { %v1292_v18 = vpack.c.bf16 %v1202_v29, %v1198_v20 }
 0x437   : > { %1355 = vmatprep.subr.bf16.mxu1 %v1292_v18 }
 0x438   : > { %1356 = vmatpush1.bf16.msra.mxu1 %v1291_v28 }
 0x439   : > { %v1206_v25 = vpop.f32.mrb[40].mxu0 }
 0x43a   : > { %v1208_v24 = vpop.f32.mrb[41].mxu0 }
 0x43b   : > { %v1210_v27 = vpop.f32.mrb[42].mxu0 }
 0x43c   : > { %v1293_v30 = vpack.c.bf16 %v1210_v27, %v1206_v25  ;;  %v1212_v32 = vpop.f32.mrb[43].mxu0 }
 0x43d   : > { %v1294_v40 = vpack.c.bf16 %v1212_v32, %v1208_v24 }
 0x43f   : > { %1357 = vmatprep.subr.bf16.mxu1 %v1294_v40 }
 0x440   : > { %1358 = vmatpush1.bf16.msra.mxu1 %v1293_v30 }
 0x441   : > { %v1216_v41 = vpop.f32.mrb[44].mxu0 }
 0x442   : > { %v1218_v42 = vpop.f32.mrb[45].mxu0 }
 0x443   : > { %v1220_v43 = vpop.f32.mrb[46].mxu0 }
 0x444   : > { %v1295_v44 = vpack.c.bf16 %v1220_v43, %v1216_v41  ;;  %v1222_v45 = vpop.f32.mrb[47].mxu0 }
 0x445   : > { %v1296_v47 = vpack.c.bf16 %v1222_v45, %v1218_v42 }
 0x447   : > { %1359 = vmatprep.subr.bf16.mxu1 %v1296_v47  ;;  %v1995_v47 = vld [vmem:[%s2461_s6] sm:$0xff]  }
 0x448   : > { %1360 = vmatpush1.bf16.msra.mxu1 %v1295_v44 }
 0x449   : > { %v1226_v52 = vpop.f32.mrb[48].mxu0 }
 0x44a   : > { %v1228_v56 = vpop.f32.mrb[49].mxu0 }
 0x44b   : > { %v1230_v57 = vpop.f32.mrb[50].mxu0 }
 0x44c   : > { %v1297_v59 = vpack.c.bf16 %v1230_v57, %v1226_v52  ;;  %v1232_v63 = vpop.f32.mrb[51].mxu0  ;;  %v1996_v52 = vld [vmem:[%s2461_s6 + $0x8] sm:$0xff]   ;;  %v1998_v57 = vld [vmem:[%s2461_s6 + $0x18] sm:$0xff]  }
 0x44d   : > { %v1298_v1 = vpack.c.bf16 %v1232_v63, %v1228_v56  ;;  %v1997_v56 = vld [vmem:[%s2461_s6 + $0x10] sm:$0xff]   ;;  %v2000_v63 = vld [vmem:[%s2461_s6 + $0x28] sm:$0xff]  }
 0x44f   : > { %1361 = vmatprep.subr.bf16.mxu1 %v1298_v1  ;;  %v2001_v1 = vld [vmem:[%s2461_s6 + $0x30] sm:$0xff]  }
 0x450   : > { %1362 = vmatpush1.bf16.msra.mxu1 %v1297_v59  ;;  %v1999_v59 = vld [vmem:[%s2461_s6 + $0x20] sm:$0xff]  }
 0x451   : > { %v1236_v2 = vpop.f32.mrb[52].mxu0 }
 0x452   : > { %v1238_v3 = vpop.f32.mrb[53].mxu0 }
 0x453   : > { %v1240_v5 = vpop.f32.mrb[54].mxu0 }
 0x454   : > { %v1299_v13 = vpack.c.bf16 %v1240_v5, %v1236_v2  ;;  %v1242_v14 = vpop.f32.mrb[55].mxu0  ;;  %v2002_v2 = vld [vmem:[%s2461_s6 + $0x38] sm:$0xff]  }
 0x455   : > { %v1300_v15 = vpack.c.bf16 %v1242_v14, %v1238_v3 }
 0x457   : > { %1363 = vmatprep.subr.bf16.mxu1 %v1300_v15 }
 0x458   : > { %1364 = vmatpush1.bf16.msra.mxu1 %v1299_v13 }
 0x459   : > { %v1246_v16 = vpop.f32.mrb[56].mxu0 }
 0x45a   : > { %v1248_v17 = vpop.f32.mrb[57].mxu0 }
 0x45b   : > { %v1250_v20 = vpop.f32.mrb[58].mxu0 }
 0x45c   : > { %v1301_v26 = vpack.c.bf16 %v1250_v20, %v1246_v16  ;;  %v1252_v28 = vpop.f32.mrb[59].mxu0 }
 0x45d   : > { %v1302_v29 = vpack.c.bf16 %v1252_v28, %v1248_v17 }
 0x45f   : > { %1365 = vmatprep.subr.bf16.mxu1 %v1302_v29 }
 0x460   : > { %1366 = vmatpush1.bf16.msra.mxu1 %v1301_v26 }
 0x461   : > { %v1256_v18 = vpop.f32.mrb[60].mxu0 }
 0x462   : > { %v1258_v25 = vpop.f32.mrb[61].mxu0 }
 0x463   : > { %v1260_v24 = vpop.f32.mrb[62].mxu0 }
 0x464   : > { %v1303_v27 = vpack.c.bf16 %v1260_v24, %v1256_v18  ;;  %v1262_v30 = vpop.f32.mrb[63].mxu0 }
 0x465   : > { %v1304_v32 = vpack.c.bf16 %v1262_v30, %v1258_v25 }
 0x467   : > { %1367 = vmatprep.subr.bf16.mxu1 %v1304_v32 }
 0x468   : > { %1368 = vmatpush1.bf16.msra.mxu1 %v1303_v27 }
 0x469   : > { %v1266_v40 = vpop.f32.mrb[64].mxu0 }
 0x46a   : > { %v1268_v41 = vpop.f32.mrb[65].mxu0 }
 0x46b   : > { %v1270_v42 = vpop.f32.mrb[66].mxu0 }
 0x46c   : > { %v1305_v43 = vpack.c.bf16 %v1270_v42, %v1266_v40  ;;  %v1272_v44 = vpop.f32.mrb[67].mxu0 }
 0x46d   : > { %v1306_v45 = vpack.c.bf16 %v1272_v44, %v1268_v41 }
 0x46f   : > { %1369 = vmatprep.subr.bf16.mxu1 %v1306_v45 }
 0x470   : > { %1370 = vmatpush1.bf16.msra.mxu1 %v1305_v43 }
 0x473   : > { %1388 = vmatmul.mubr.bf16.vlgmr.msra.gmra.mrb[32].mxu1 %v1995_v47 }
 0x474   : > { %1397 = vmatprep.mubr.bf16.mxu1 %v2039_v0 }
 0x47b   : > { %1398 = vmatmul.mubr.bf16.gmra.mrb[36].mxu1 %v1996_v52 }
 0x47c   : > { %1407 = vmatprep.mubr.bf16.mxu1 %v2039_v0 }
 0x483   : > { %1408 = vmatmul.mubr.bf16.gmra.mrb[40].mxu1 %v1997_v56 }
 0x484   : > { %1417 = vmatprep.mubr.bf16.mxu1 %v2039_v0 }
 0x48b   : > { %1418 = vmatmul.mubr.bf16.gmra.mrb[44].mxu1 %v1998_v57 }
 0x48c   : > { %1427 = vmatprep.mubr.bf16.mxu1 %v2039_v0 }
 0x493   : > { %1428 = vmatmul.mubr.bf16.gmra.mrb[48].mxu1 %v1999_v59 }
 0x494   : > { %1437 = vmatprep.mubr.bf16.mxu1 %v2039_v0 }
 0x49b   : > { %1438 = vmatmul.mubr.bf16.gmra.mrb[52].mxu1 %v2000_v63 }
 0x49c   : > { %1447 = vmatprep.mubr.bf16.mxu1 %v2039_v0 }
 0x4a3   : > { %1448 = vmatmul.mubr.bf16.gmra.mrb[56].mxu1 %v2001_v1 }
 0x4a4   : > { %1457 = vmatprep.mubr.bf16.mxu1 %v2039_v0 }
 0x4ab   : > { %1458 = vmatmul.mubr.bf16.gmra.mrb[60].mxu1 %v2002_v2 }
 0x546   : > { %v1389_v3 = vpop.f32.mrb[32].mxu1 }
 0x547   : > { %v1468_v5 = vadd.f32 %v1389_v3, %v2201_v39  ;;  %v1391_v13 = vpop.f32.mrb[33].mxu1 }
 0x548   : > { %v1469_v14 = vadd.f32 %v1391_v13, %v2197_v36  ;;  %v1393_v15 = vpop.f32.mrb[34].mxu1 }
 0x549   : > { %v1470_v0 = vadd.f32 %v1393_v15, %v2195_v34  ;;  %v1395_v16 = vpop.f32.mrb[35].mxu1 }
 0x54a   : > { %v1925_v17 = vpack.c.bf16 %v1469_v14, %v1468_v5  ;;  %v1471_v20 = vadd.f32 %v1395_v16, %v2199_v38 }
 0x54b   : > { %v1500_v26 = vpack.c.bf16 %v1470_v0, %v1468_v5 }
 0x54c   : > { %1596 = vst [vmem:[%s2391_s24] sm:$0xff] %v1925_v17  ;;  %v1501_v39 = vpack.c.bf16 %v1471_v20, %v1469_v14  ;;  %v1926_v36 = vpack.c.bf16 %v1471_v20, %v1470_v0 }
 0x54e   : > { %1597 = vst [vmem:[%s2391_s24 + $0x8] sm:$0xff] %v1926_v36  ;;  %v1399_v28 = vpop.f32.mrb[36].mxu1  ;;  %1613 = vmatprep.subr.bf16.mxu0 %v1501_v39 }
 0x54f   : > { %v1472_v29 = vadd.f32 %v1399_v28, %v2213_v50  ;;  %v1401_v18 = vpop.f32.mrb[37].mxu1  ;;  %1614 = vmatpush1.bf16.msra.mxu0 %v1500_v26 }
 0x550   : > { %v1473_v25 = vadd.f32 %v1401_v18, %v2209_v48  ;;  %v1403_v34 = vpop.f32.mrb[38].mxu1 }
 0x551   : > { %v1474_v24 = vadd.f32 %v1403_v34, %v2207_v46  ;;  %v1405_v27 = vpop.f32.mrb[39].mxu1 }
 0x552   : > { %v1927_v38 = vpack.c.bf16 %v1473_v25, %v1472_v29  ;;  %v1475_v30 = vadd.f32 %v1405_v27, %v2211_v49 }
 0x553   : > { %v1502_v32 = vpack.c.bf16 %v1474_v24, %v1472_v29 }
 0x554   : > { %1598 = vst [vmem:[%s2391_s24 + $0x10] sm:$0xff] %v1927_v38  ;;  %v1503_v40 = vpack.c.bf16 %v1475_v30, %v1473_v25  ;;  %v1928_v41 = vpack.c.bf16 %v1475_v30, %v1474_v24 }
 0x556   : > { %1599 = vst [vmem:[%s2391_s24 + $0x18] sm:$0xff] %v1928_v41  ;;  %v1409_v42 = vpop.f32.mrb[40].mxu1  ;;  %1615 = vmatprep.subr.bf16.mxu0 %v1503_v40 }
 0x557   : > { %v1476_v50 = vadd.f32 %v1409_v42, %v2225_v62  ;;  %v1411_v43 = vpop.f32.mrb[41].mxu1  ;;  %1616 = vmatpush1.bf16.msra.mxu0 %v1502_v32 }
 0x558   : > { %v1477_v48 = vadd.f32 %v1411_v43, %v2221_v60  ;;  %v1413_v46 = vpop.f32.mrb[42].mxu1 }
 0x559   : > { %v1478_v44 = vadd.f32 %v1413_v46, %v2219_v58  ;;  %v1415_v45 = vpop.f32.mrb[43].mxu1 }
 0x55a   : > { %v1929_v49 = vpack.c.bf16 %v1477_v48, %v1476_v50  ;;  %v1479_v47 = vadd.f32 %v1415_v45, %v2223_v61 }
 0x55b   : > { %v1504_v52 = vpack.c.bf16 %v1478_v44, %v1476_v50 }
 0x55c   : > { %1600 = vst [vmem:[%s2391_s24 + $0x20] sm:$0xff] %v1929_v49  ;;  %v1505_v56 = vpack.c.bf16 %v1479_v47, %v1477_v48  ;;  %v1930_v57 = vpack.c.bf16 %v1479_v47, %v1478_v44 }
 0x55e   : > { %1601 = vst [vmem:[%s2391_s24 + $0x28] sm:$0xff] %v1930_v57  ;;  %v1419_v59 = vpop.f32.mrb[44].mxu1  ;;  %1617 = vmatprep.subr.bf16.mxu0 %v1505_v56 }
 0x55f   : > { %v1480_v62 = vadd.f32 %v1419_v59, %v2237_v11  ;;  %v1421_v63 = vpop.f32.mrb[45].mxu1  ;;  %1618 = vmatpush1.bf16.msra.mxu0 %v1504_v52 }
 0x560   : > { %v1481_v60 = vadd.f32 %v1421_v63, %v2233_v9  ;;  %v1423_v58 = vpop.f32.mrb[46].mxu1 }
 0x561   : > { %v1482_v1 = vadd.f32 %v1423_v58, %v2231_v7  ;;  %v1425_v2 = vpop.f32.mrb[47].mxu1 }
 0x562   : > { %v1931_v61 = vpack.c.bf16 %v1481_v60, %v1480_v62  ;;  %v1483_v3 = vadd.f32 %v1425_v2, %v2235_v10 }
 0x563   : > { %v1506_v5 = vpack.c.bf16 %v1482_v1, %v1480_v62 }
 0x564   : > { %1602 = vst [vmem:[%s2391_s24 + $0x30] sm:$0xff] %v1931_v61  ;;  %v1507_v13 = vpack.c.bf16 %v1483_v3, %v1481_v60  ;;  %v1932_v14 = vpack.c.bf16 %v1483_v3, %v1482_v1 }
 0x566   : > { %1603 = vst [vmem:[%s2391_s24 + $0x38] sm:$0xff] %v1932_v14  ;;  %v1429_v15 = vpop.f32.mrb[48].mxu1  ;;  %1619 = vmatprep.subr.bf16.mxu0 %v1507_v13 }
 0x567   : > { %v1484_v11 = vadd.f32 %v1429_v15, %v2249_v23  ;;  %v1431_v0 = vpop.f32.mrb[49].mxu1  ;;  %1620 = vmatpush1.bf16.msra.mxu0 %v1506_v5 }
 0x568   : > { %v1485_v9 = vadd.f32 %v1431_v0, %v2245_v21  ;;  %v1433_v7 = vpop.f32.mrb[50].mxu1 }
 0x569   : > { %v1486_v16 = vadd.f32 %v1433_v7, %v2243_v19  ;;  %v1435_v17 = vpop.f32.mrb[51].mxu1 }
 0x56a   : > { %v1933_v10 = vpack.c.bf16 %v1485_v9, %v1484_v11  ;;  %v1487_v20 = vadd.f32 %v1435_v17, %v2247_v22 }
 0x56b   : > { %v1508_v26 = vpack.c.bf16 %v1486_v16, %v1484_v11 }
 0x56c   : > { %1604 = vst [vmem:[%s2391_s24 + $0x40] sm:$0xff] %v1933_v10  ;;  %v1509_v39 = vpack.c.bf16 %v1487_v20, %v1485_v9  ;;  %v1934_v36 = vpack.c.bf16 %v1487_v20, %v1486_v16 }
 0x56e   : > { %1605 = vst [vmem:[%s2391_s24 + $0x48] sm:$0xff] %v1934_v36  ;;  %v1439_v28 = vpop.f32.mrb[52].mxu1  ;;  %1621 = vmatprep.subr.bf16.mxu0 %v1509_v39 }
 0x56f   : > { %v1488_v23 = vadd.f32 %v1439_v28, %v2261_v37  ;;  %v1441_v29 = vpop.f32.mrb[53].mxu1  ;;  %1622 = vmatpush1.bf16.msra.mxu0 %v1508_v26 }
 0x570   : > { %v1489_v21 = vadd.f32 %v1441_v29, %v2257_v33  ;;  %v1443_v19 = vpop.f32.mrb[54].mxu1 }
 0x571   : > { %v1490_v18 = vadd.f32 %v1443_v19, %v2255_v31  ;;  %v1445_v25 = vpop.f32.mrb[55].mxu1 }
 0x572   : > { %v1935_v22 = vpack.c.bf16 %v1489_v21, %v1488_v23  ;;  %v1491_v34 = vadd.f32 %v1445_v25, %v2259_v35 }
 0x573   : > { %v1510_v24 = vpack.c.bf16 %v1490_v18, %v1488_v23 }
 0x574   : > { %1606 = vst [vmem:[%s2391_s24 + $0x50] sm:$0xff] %v1935_v22  ;;  %v1511_v27 = vpack.c.bf16 %v1491_v34, %v1489_v21  ;;  %v1936_v38 = vpack.c.bf16 %v1491_v34, %v1490_v18 }
 0x576   : > { %1607 = vst [vmem:[%s2391_s24 + $0x58] sm:$0xff] %v1936_v38  ;;  %v1449_v30 = vpop.f32.mrb[56].mxu1  ;;  %1623 = vmatprep.subr.bf16.mxu0 %v1511_v27 }
 0x577   : > { %v1492_v37 = vadd.f32 %v1449_v30, %v2273_v55  ;;  %v1451_v32 = vpop.f32.mrb[57].mxu1  ;;  %1624 = vmatpush1.bf16.msra.mxu0 %v1510_v24 }
 0x578   : > { %v1493_v33 = vadd.f32 %v1451_v32, %v2269_v53  ;;  %v1453_v31 = vpop.f32.mrb[58].mxu1 }
 0x579   : > { %v1494_v40 = vadd.f32 %v1453_v31, %v2267_v51  ;;  %v1455_v41 = vpop.f32.mrb[59].mxu1 }
 0x57a   : > { %v1937_v35 = vpack.c.bf16 %v1493_v33, %v1492_v37  ;;  %v1495_v42 = vadd.f32 %v1455_v41, %v2271_v54 }
 0x57b   : > { %v1512_v50 = vpack.c.bf16 %v1494_v40, %v1492_v37 }
 0x57c   : > { %1608 = vst [vmem:[%s2391_s24 + $0x60] sm:$0xff] %v1937_v35  ;;  %v1513_v43 = vpack.c.bf16 %v1495_v42, %v1493_v33  ;;  %v1938_v48 = vpack.c.bf16 %v1495_v42, %v1494_v40 }
 0x57e   : > { %1609 = vst [vmem:[%s2391_s24 + $0x68] sm:$0xff] %v1938_v48  ;;  %v1459_v46 = vpop.f32.mrb[60].mxu1  ;;  %1625 = vmatprep.subr.bf16.mxu0 %v1513_v43 }
 0x57f   : > { %v1496_v55 = vadd.f32 %v1459_v46, %v2285_v12  ;;  %v1461_v44 = vpop.f32.mrb[61].mxu1  ;;  %1626 = vmatpush1.bf16.msra.mxu0 %v1512_v50  ;;  %v1612_v12 = vld [vmem:[%s2462_s7] sm:$0x3] }
 0x580   : > { %v1497_v53 = vadd.f32 %v1461_v44, %v2281_v6  ;;  %v1463_v51 = vpop.f32.mrb[62].mxu1 }
 0x581   : > { %v1498_v45 = vadd.f32 %v1463_v51, %v2279_v4  ;;  %v1465_v54 = vpop.f32.mrb[63].mxu1 }
 0x582   : > { %v1939_v49 = vpack.c.bf16 %v1497_v53, %v1496_v55  ;;  %v1499_v47 = vadd.f32 %v1465_v54, %v2283_v8 }
 0x583   : > { %v1514_v52 = vpack.c.bf16 %v1498_v45, %v1496_v55 }
 0x584   : > { %1610 = vst [vmem:[%s2391_s24 + $0x70] sm:$0xff] %v1939_v49  ;;  %v1515_v56 = vpack.c.bf16 %v1499_v47, %v1497_v53  ;;  %v1940_v57 = vpack.c.bf16 %v1499_v47, %v1498_v45 }
 0x586   : > { %1611 = vst [vmem:[%s2391_s24 + $0x78] sm:$0xff] %v1940_v57  ;;  %1627 = vmatprep.subr.bf16.mxu0 %v1515_v56 }
 0x587   : > { %1628 = vmatpush1.bf16.msra.mxu0 %v1514_v52 }
 0x58a   : > { %1646 = vmatmul.mubr.bf16.vlgmr.msra.gmra.mrb[68].mxu0 %v1612_v12 }
 0x65d   : > { %v1647_v6 = vpop.f32.mrb[68].mxu0 }
 0x65e   : > { %v1649_v4 = vpop.f32.mrb[69].mxu0 }
 0x65f   : > { %v1656_v59 = vcombine.low %v1647_v6, %v1649_v4  ;;  %v1651_v8 = vpop.f32.mrb[70].mxu0 }
 0x660   : > { %v1652_v62 = vpop.f32.mrb[71].mxu0 }
 0x661   : > { %1658 = vst [vmem:[%s444_s20] sm:$0xff] %v1656_v59 }
 0x662 PF: > { %s20_s11 = sadd.s32 1, %s2037_s11   ;;  %s2465_s30 = smov %s2033_s10 }
 0x663   : > { %p17_p5 = scmp.ge.s32.totalorder %s20_s11, 4   ;;  %s2466_s10 = smov %s2468_s12 }
 0x665   :  { %19 = sbr.rel (!%p17_p5) target bundleno = 2 (0x2), region = 103 }

</bundles_post_ra>
